<compile_context>
chip_gen: v7x
topology: tpu7x:2x2x1
jax: 0.10.0
libtpu: 0.0.40
codegen_flags: <defaults>
</compile_context>

<pallas_src>
import functools

import jax
import jax.numpy as jnp
from jax.experimental import pallas as pl
from jax.experimental.pallas import tpu as pltpu


def _round_up(x, m):
    return ((x + m - 1) // m) * m


def _esm2_prefix_kernel(x_ref, w_len_ref, w_all_ref, bias_ref, o_ref, g_ref,
                        *, block_b, lp):
    # x_ref:     (block_b, N, Fin)      batch block of the input
    # w_len_ref: (Lp, N)                zero-padded length-mixing weight
    # w_all_ref: (Fop, Fin)             zero-padded feature weight (PyTorch layout)
    # bias_ref:  (block_b*Lp, Fop) f32  folded bias, pre-tiled over the block
    # o_ref:     (block_b*Lp, Fop)      lane/sublane-dense output slab
    # g_ref:     (block_b*Lp, Fin) f32  scratch for the length-mixed activations

    wl = w_len_ref[...].astype(x_ref.dtype)          # (Lp, N); no-op for f32

    # ---- 1) length mixing first (the cheap contraction, K = N) ----
    # Static, small trip count; every store lands on an 8-row (sublane-tile)
    # aligned offset because Lp % 8 == 0, so no masked stores / relayouts.
    for b in range(block_b):
        g_ref[b * lp:(b + 1) * lp, :] = jax.lax.dot_general(
            wl, x_ref[b],
            dimension_numbers=(((1,), (0,)), ((), ())),
            preferred_element_type=jnp.float32)       # (Lp, Fin) f32

    # ---- 2) one fused feature matmul over the whole batch block ----
    #   y[(b,l), o] = sum_f g[(b,l), f] * W_all[o, f]
    y = jax.lax.dot_general(
        g_ref[...], w_all_ref[...].astype(jnp.float32),
        dimension_numbers=(((1,), (1,)), ((), ())),
        preferred_element_type=jnp.float32)           # (block_b*Lp, Fop) f32

    # Single dense store for the whole block (no per-b sub-stores).
    o_ref[...] = (y + bias_ref[...]).astype(o_ref.dtype)


def _vmem_estimate(block_b, n, fin, lp, fop, itemsize):
    """Conservative per-step VMEM footprint (bytes)."""
    rows = block_b * lp
    x_tile = 2 * block_b * n * fin * itemsize          # double-buffered input
    out_tile = 2 * rows * fop * itemsize               # double-buffered output
    invariants = (lp * n + fop * fin) * itemsize + rows * fop * 4
    scratch = rows * fin * 4                           # g (f32)
    interm = rows * fop * 4                            # y (f32) before store cast
    # assume invariants may still be double-buffered (fallback path)
    return x_tile + out_tile + 2 * invariants + scratch + interm


def _pick_block_b(B, n, fin, lp, fop, itemsize, *,
                  max_x_rows=2048, vmem_budget=40 << 20, min_steps=4):
    """Largest batch block that (a) divides B, (b) fits a conservative VMEM
    budget (v7x: 64 MiB physical / 32 MiB scoped default), (c) keeps the x
    tile modest, and (d) leaves >= min_steps grid steps when possible so both
    TensorCores on dual-core parts each get >= 2 pipelined steps."""
    divisors = [d for d in range(1, B + 1) if B % d == 0]

    def fits(d):
        return (d * n <= max_x_rows and
                _vmem_estimate(d, n, fin, lp, fop, itemsize) <= vmem_budget)

    want_steps = min(min_steps, B)
    preferred = [d for d in divisors if fits(d) and B // d >= want_steps]
    if preferred:
        return max(preferred)
    fitting = [d for d in divisors if fits(d)]
    if fitting:
        return max(fitting)
    return 1


def esm2_encoder_prefix(x, w_all, b_all, w_len, b_len, *, block_b=None):
    """x: (B, esm_len_in, in_feature) -> (B, esm_len_out, out_feature)."""
    B, N, Fin = x.shape
    Fout, Fin2 = w_all.shape
    Lout, N2 = w_len.shape
    assert Fin2 == Fin and N2 == N, (w_all.shape, w_len.shape, x.shape)

    # ---- host-side layout prep: zero-pad to TPU-friendly tile multiples ----
    lp = _round_up(Lout, 8)      # sublane-dense rows for the fused matmul/store
    fop = _round_up(Fout, 128)   # lane-dense (unmasked vst) output columns
    f32 = jnp.float32

    w_len_p = jnp.pad(w_len, ((0, lp - Lout), (0, 0)))
    w_all_p = jnp.pad(w_all, ((0, fop - Fout), (0, 0)))
    b_all_p = jnp.pad(b_all, ((0, fop - Fout),))
    b_len_p = jnp.pad(b_len, ((0, lp - Lout),))

    # Fold both biases (valid because the second linear is applied after the
    # first):  bias[l, o] = b_len[l] + (sum_n W_len[l, n]) * b_all[o].
    bias = (b_len_p.astype(f32)[:, None]
            + jnp.sum(w_len_p.astype(f32), axis=1, keepdims=True)
            * b_all_p.astype(f32)[None, :])                      # (lp, fop)

    if block_b is None:
        block_b = _pick_block_b(B, N, Fin, lp, fop, x.dtype.itemsize)
    assert B % block_b == 0, (B, block_b)
    grid = (B // block_b,)
    rows = block_b * lp

    bias_tiled = jnp.tile(bias, (block_b, 1))                    # (rows, fop) f32

    kernel = functools.partial(_esm2_prefix_kernel, block_b=block_b, lp=lp)

    # Advisory cost for XLA scheduling around the custom call.
    flops = 2 * B * lp * N * Fin + 2 * B * lp * Fin * fop
    bytes_accessed = (x.size * x.dtype.itemsize
                      + w_len_p.size * w_len_p.dtype.itemsize
                      + w_all_p.size * w_all_p.dtype.itemsize
                      + bias_tiled.size * 4
                      + B * lp * fop * x.dtype.itemsize)
    cost = pl.CostEstimate(flops=flops, transcendentals=0,
                           bytes_accessed=bytes_accessed)

    # Only raise the scoped-VMEM limit when the tile plan actually needs it.
    vmem_est = _vmem_estimate(block_b, N, Fin, lp, fop, x.dtype.itemsize)
    vmem_limit = None
    if vmem_est > (16 << 20):
        vmem_limit = min(int(vmem_est * 1.5) + (4 << 20), 100 << 20)

    def build(single_buffer_invariants):
        inv_kw = ({"pipeline_mode": pl.Buffered(1)}
                  if single_buffer_invariants else {})
        in_specs = [
            pl.BlockSpec((block_b, N, Fin), lambda i: (i, 0, 0)),
            pl.BlockSpec((lp, N), lambda i: (0, 0), **inv_kw),
            pl.BlockSpec((fop, Fin), lambda i: (0, 0), **inv_kw),
            pl.BlockSpec((rows, fop), lambda i: (0, 0), **inv_kw),
        ]
        return pl.pallas_call(
            kernel,
            out_shape=jax.ShapeDtypeStruct((B * lp, fop), x.dtype),
            grid=grid,
            in_specs=in_specs,
            out_specs=pl.BlockSpec((rows, fop), lambda i: (i, 0)),
            scratch_shapes=[pltpu.VMEM((rows, Fin), jnp.float32)],
            compiler_params=pltpu.CompilerParams(
                dimension_semantics=("parallel",),
                vmem_limit_bytes=vmem_limit),
            cost_estimate=cost,
        )

    try:
        # Grid-invariant operands single-buffered (saves VMEM, esp. on v7x).
        out2d = build(True)(x, w_len_p, w_all_p, bias_tiled)
    except Exception:
        # This JAX build rejects pl.Buffered(1); default double buffering.
        out2d = build(False)(x, w_len_p, w_all_p, bias_tiled)

    # Strip the zero padding (pad rows/cols are exactly zero by construction).
    return out2d.reshape(B, lp, fop)[:, :Lout, :Fout]


def _reference(x, w_all, b_all, w_len, b_len):
    # Pure-JAX reference mirroring the PyTorch forward exactly.
    h = jnp.einsum('bnf,of->bno', x, w_all) + b_all          # Linear over features
    h = jnp.transpose(h, (0, 2, 1))                          # b n c -> b c n
    y = jnp.einsum('bcn,ln->bcl', h, w_len) + b_len          # Linear over length
    return jnp.transpose(y, (0, 2, 1))                       # b n c -> b c n


if __name__ == "__main__":
    # Small synthetic shapes consistent with the module.
    B = 4
    in_feature = 32
    out_feature = 16
    esm_len_in = 16
    esm_len_out = 4

    key = jax.random.PRNGKey(0)
    kx, kw1, kb1, kw2, kb2 = jax.random.split(key, 5)

    x = jax.random.normal(kx, (B, esm_len_in, in_feature), dtype=jnp.float32)

    # NOTE: the module's __init__ constant-inits all params to 0 (output would be
    # trivially zero).  Use deterministic nonzero params so the compute path is
    # actually exercised; shapes match the module exactly.
    w_all = jax.random.normal(kw1, (out_feature, in_feature), jnp.float32) * 0.1
    b_all = jax.random.normal(kb1, (out_feature,), jnp.float32) * 0.1
    w_len = jax.random.normal(kw2, (esm_len_out, esm_len_in), jnp.float32) * 0.1
    b_len = jax.random.normal(kb2, (esm_len_out,), jnp.float32) * 0.1

    ref = _reference(x, w_all, b_all, w_len, b_len)

    # Default path: auto-picked block (block_b=1 here -> 4 parallel grid steps).
    out = jax.block_until_ready(esm2_encoder_prefix(x, w_all, b_all, w_len, b_len))
    assert out.shape == (B, esm_len_out, out_feature), out.shape
    assert jnp.allclose(out, ref, atol=1e-5, rtol=1e-5), "mismatch vs reference"

    # Also exercise the fused multi-batch block path (block_b > 1).
    out2 = jax.block_until_ready(
        esm2_encoder_prefix(x, w_all, b_all, w_len, b_len, block_b=2))
    assert jnp.allclose(out2, ref, atol=1e-5, rtol=1e-5), "mismatch (block_b=2)"

    print("KERNEL_OK")
</pallas_src>

<mosaic_0001>
module attributes {stable_mosaic.version = 11 : i64} {
  func.func @_esm2_prefix_kernel(%arg0: i32, %arg1: memref<1x16x32xf32, #tpu.memory_space<vmem>>, %arg2: memref<8x16xf32, #tpu.memory_space<vmem>>, %arg3: memref<128x32xf32, #tpu.memory_space<vmem>>, %arg4: memref<8x128xf32, #tpu.memory_space<vmem>>, %arg5: memref<8x128xf32, #tpu.memory_space<vmem>>, %arg6: memref<8x32xf32, #tpu.memory_space<vmem>>) attributes {dimension_semantics = [#tpu.dimension_semantics<parallel>], iteration_bounds = array<i64: 4>, scalar_prefetch = 0 : i64, scratch_operands = 1 : i64, tpu.core_type = #tpu.core_type<tc>, window_params = [{transform_indices = @transform_0, window_bounds = array<i64: 1, 16, 32>}, {pipeline_mode = #tpu.pipeline_mode<synchronous>, transform_indices = @transform_1, window_bounds = array<i64: 8, 16>}, {pipeline_mode = #tpu.pipeline_mode<synchronous>, transform_indices = @transform_2, window_bounds = array<i64: 128, 32>}, {pipeline_mode = #tpu.pipeline_mode<synchronous>, transform_indices = @transform_3, window_bounds = array<i64: 8, 128>}, {transform_indices = @transform_4, window_bounds = array<i64: 8, 128>}]} {
    %c0 = arith.constant 0 : index
    %c0_0 = arith.constant 0 : index
    %0 = vector.load %arg2[%c0, %c0_0] : memref<8x16xf32, #tpu.memory_space<vmem>>, vector<8x16xf32>
    %c0_1 = arith.constant 0 : index
    %c0_2 = arith.constant 0 : index
    %c0_3 = arith.constant 0 : index
    %1 = vector.load %arg1[%c0_1, %c0_2, %c0_3] : memref<1x16x32xf32, #tpu.memory_space<vmem>>, vector<1x16x32xf32>
    %2 = vector.shape_cast %1 : vector<1x16x32xf32> to vector<16x32xf32>
    %cst = arith.constant dense<0.000000e+00> : vector<8x32xf32>
    %3 = tpu.matmul %0, %2, %cst {dimension_numbers = #tpu.dot_dimension_numbers<[1], [0], [0], [1], [0, 0, 1, 1], [], []>} : vector<8x16xf32>, vector<16x32xf32>, vector<8x32xf32> -> vector<8x32xf32>
    %c0_4 = arith.constant 0 : index
    %c0_5 = arith.constant 0 : index
    %4 = vector.load %arg6[%c0_4, %c0_5] : memref<8x32xf32, #tpu.memory_space<vmem>>, vector<8x32xf32>
    tpu.vector_store %arg6[%c0_4, %c0_5], %3 {strides = array<i32>} : memref<8x32xf32, #tpu.memory_space<vmem>>, vector<8x32xf32>,
    %c0_6 = arith.constant 0 : index
    %c0_7 = arith.constant 0 : index
    %5 = vector.load %arg6[%c0_6, %c0_7] : memref<8x32xf32, #tpu.memory_space<vmem>>, vector<8x32xf32>
    %c0_8 = arith.constant 0 : index
    %c0_9 = arith.constant 0 : index
    %6 = vector.load %arg3[%c0_8, %c0_9] : memref<128x32xf32, #tpu.memory_space<vmem>>, vector<128x32xf32>
    %cst_10 = arith.constant dense<0.000000e+00> : vector<8x128xf32>
    %7 = tpu.matmul %5, %6, %cst_10 {dimension_numbers = #tpu.dot_dimension_numbers<[1], [1], [0], [0], [0, 0, 1, 0], [], []>} : vector<8x32xf32>, vector<128x32xf32>, vector<8x128xf32> -> vector<8x128xf32>
    %c0_11 = arith.constant 0 : index
    %c0_12 = arith.constant 0 : index
    %8 = vector.load %arg4[%c0_11, %c0_12] : memref<8x128xf32, #tpu.memory_space<vmem>>, vector<8x128xf32>
    %9 = arith.addf %7, %8 : vector<8x128xf32>
    %c0_13 = arith.constant 0 : index
    %c0_14 = arith.constant 0 : index
    %10 = vector.load %arg5[%c0_13, %c0_14] : memref<8x128xf32, #tpu.memory_space<vmem>>, vector<8x128xf32>
    tpu.vector_store %arg5[%c0_13, %c0_14], %9 {strides = array<i32>} : memref<8x128xf32, #tpu.memory_space<vmem>>, vector<8x128xf32>,
    return
  }
  func.func @transform_0(%arg0: i32) -> (i32, i32, i32) {
    %c0_i32 = arith.constant 0 : i32
    %c0_i32_0 = arith.constant 0 : i32
    %c0_i32_1 = arith.constant 0 : i32
    return %arg0, %c0_i32, %c0_i32_0 : i32, i32, i32
  }
  func.func @transform_1(%arg0: i32) -> (i32, i32) {
    %c0_i32 = arith.constant 0 : i32
    %c0_i32_0 = arith.constant 0 : i32
    %c0_i32_1 = arith.constant 0 : i32
    return %c0_i32, %c0_i32_0 : i32, i32
  }
  func.func @transform_2(%arg0: i32) -> (i32, i32) {
    %c0_i32 = arith.constant 0 : i32
    %c0_i32_0 = arith.constant 0 : i32
    %c0_i32_1 = arith.constant 0 : i32
    return %c0_i32, %c0_i32_0 : i32, i32
  }
  func.func @transform_3(%arg0: i32) -> (i32, i32) {
    %c0_i32 = arith.constant 0 : i32
    %c0_i32_0 = arith.constant 0 : i32
    %c0_i32_1 = arith.constant 0 : i32
    return %c0_i32, %c0_i32_0 : i32, i32
  }
  func.func @transform_4(%arg0: i32) -> (i32, i32) {
    %c0_i32 = arith.constant 0 : i32
    %c0_i32_0 = arith.constant 0 : i32
    return %arg0, %c0_i32 : i32, i32
  }
}

module attributes {stable_mosaic.version = 11 : i64} {
  func.func @_esm2_prefix_kernel(%arg0: i32, %arg1: memref<1x16x32xf32, #tpu.memory_space<vmem>>, %arg2: memref<8x16xf32, #tpu.memory_space<vmem>>, %arg3: memref<128x32xf32, #tpu.memory_space<vmem>>, %arg4: memref<8x128xf32, #tpu.memory_space<vmem>>, %arg5: memref<8x128xf32, #tpu.memory_space<vmem>>, %arg6: memref<8x32xf32, #tpu.memory_space<vmem>>) attributes {dimension_semantics = [#tpu.dimension_semantics<parallel>], iteration_bounds = array<i64: 4>, scalar_prefetch = 0 : i64, scratch_operands = 1 : i64, tpu.core_type = #tpu.core_type<tc>, window_params = [{transform_indices = @transform_0, window_bounds = array<i64: 1, 16, 32>}, {pipeline_mode = #tpu.pipeline_mode<synchronous>, transform_indices = @transform_1, window_bounds = array<i64: 8, 16>}, {pipeline_mode = #tpu.pipeline_mode<synchronous>, transform_indices = @transform_2, window_bounds = array<i64: 128, 32>}, {pipeline_mode = #tpu.pipeline_mode<synchronous>, transform_indices = @transform_3, window_bounds = array<i64: 8, 128>}, {transform_indices = @transform_4, window_bounds = array<i64: 8, 128>}]} {
    %c0 = arith.constant 0 : index
    %c0_0 = arith.constant 0 : index
    %0 = vector.load %arg2[%c0, %c0_0] : memref<8x16xf32, #tpu.memory_space<vmem>>, vector<8x16xf32>
    %c0_1 = arith.constant 0 : index
    %c0_2 = arith.constant 0 : index
    %c0_3 = arith.constant 0 : index
    %1 = vector.load %arg1[%c0_1, %c0_2, %c0_3] : memref<1x16x32xf32, #tpu.memory_space<vmem>>, vector<1x16x32xf32>
    %2 = vector.shape_cast %1 : vector<1x16x32xf32> to vector<16x32xf32>
    %cst = arith.constant dense<0.000000e+00> : vector<8x32xf32>
    %3 = tpu.matmul %0, %2, %cst {dimension_numbers = #tpu.dot_dimension_numbers<[1], [0], [0], [1], [0, 0, 1, 1], [], []>} : vector<8x16xf32>, vector<16x32xf32>, vector<8x32xf32> -> vector<8x32xf32>
    %c0_4 = arith.constant 0 : index
    %c0_5 = arith.constant 0 : index
    %4 = vector.load %arg6[%c0_4, %c0_5] : memref<8x32xf32, #tpu.memory_space<vmem>>, vector<8x32xf32>
    tpu.vector_store %arg6[%c0_4, %c0_5], %3 {strides = array<i32>} : memref<8x32xf32, #tpu.memory_space<vmem>>, vector<8x32xf32>,
    %c0_6 = arith.constant 0 : index
    %c0_7 = arith.constant 0 : index
    %5 = vector.load %arg6[%c0_6, %c0_7] : memref<8x32xf32, #tpu.memory_space<vmem>>, vector<8x32xf32>
    %c0_8 = arith.constant 0 : index
    %c0_9 = arith.constant 0 : index
    %6 = vector.load %arg3[%c0_8, %c0_9] : memref<128x32xf32, #tpu.memory_space<vmem>>, vector<128x32xf32>
    %cst_10 = arith.constant dense<0.000000e+00> : vector<8x128xf32>
    %7 = tpu.matmul %5, %6, %cst_10 {dimension_numbers = #tpu.dot_dimension_numbers<[1], [1], [0], [0], [0, 0, 1, 0], [], []>} : vector<8x32xf32>, vector<128x32xf32>, vector<8x128xf32> -> vector<8x128xf32>
    %c0_11 = arith.constant 0 : index
    %c0_12 = arith.constant 0 : index
    %8 = vector.load %arg4[%c0_11, %c0_12] : memref<8x128xf32, #tpu.memory_space<vmem>>, vector<8x128xf32>
    %9 = arith.addf %7, %8 : vector<8x128xf32>
    %c0_13 = arith.constant 0 : index
    %c0_14 = arith.constant 0 : index
    %10 = vector.load %arg5[%c0_13, %c0_14] : memref<8x128xf32, #tpu.memory_space<vmem>>, vector<8x128xf32>
    tpu.vector_store %arg5[%c0_13, %c0_14], %9 {strides = array<i32>} : memref<8x128xf32, #tpu.memory_space<vmem>>, vector<8x128xf32>,
    return
  }
  func.func @transform_0(%arg0: i32) -> (i32, i32, i32) {
    %c0_i32 = arith.constant 0 : i32
    %c0_i32_0 = arith.constant 0 : i32
    %c0_i32_1 = arith.constant 0 : i32
    return %arg0, %c0_i32, %c0_i32_0 : i32, i32, i32
  }
  func.func @transform_1(%arg0: i32) -> (i32, i32) {
    %c0_i32 = arith.constant 0 : i32
    %c0_i32_0 = arith.constant 0 : i32
    %c0_i32_1 = arith.constant 0 : i32
    return %c0_i32, %c0_i32_0 : i32, i32
  }
  func.func @transform_2(%arg0: i32) -> (i32, i32) {
    %c0_i32 = arith.constant 0 : i32
    %c0_i32_0 = arith.constant 0 : i32
    %c0_i32_1 = arith.constant 0 : i32
    return %c0_i32, %c0_i32_0 : i32, i32
  }
  func.func @transform_3(%arg0: i32) -> (i32, i32) {
    %c0_i32 = arith.constant 0 : i32
    %c0_i32_0 = arith.constant 0 : i32
    %c0_i32_1 = arith.constant 0 : i32
    return %c0_i32, %c0_i32_0 : i32, i32
  }
  func.func @transform_4(%arg0: i32) -> (i32, i32) {
    %c0_i32 = arith.constant 0 : i32
    %c0_i32_0 = arith.constant 0 : i32
    return %arg0, %c0_i32 : i32, i32
  }
}

</mosaic_0001>

<bundles_post_ra>
// kernel: tpu_custom_call.1
= control target key start
LH: loop header
LB: loop body
LE: loop exit
PB: predicated region body
PF: predicated region fallthrough
CT: control target
= control target key end

     0   :  { %9 = vsyncpa [#allocation4], 0  ;;  %s928_s0 = inlined_call_operand.vmem [shape: f32[4,16,32], index: 0, kind: input, shape index: {}]   ;;  %s929_s1 = inlined_call_operand.vmem [shape: f32[8,16], index: 1, kind: input, shape index: {}]   ;;  %s930_s2 = inlined_call_operand.vmem [shape: f32[128,32], index: 2, kind: input, shape index: {}]   ;;  %s931_s3 = inlined_call_operand.vmem [shape: f32[8,128], index: 3, kind: input, shape index: {}]   ;;  %s932_s4 = inlined_call_operand.hbm [shape: f32[32,128], index: 4, kind: output, shape index: {}]  }
   0x1   :  { %11 = vsyncpa [#allocation4 + $0x1], 0  ;;  %s750_s15 = smov 0   ;;  %s752_s16 = smov 0  }
   0x2   :  { %s754_s17 = smov 0   ;;  %s756_s18 = smov 0  }
   0x3 LB: > { %s771_s19 = sadd.s32 4294967295, %s719_s18   ;;  %s488_s20 = sadd.s32 4294967294, %s719_s18   ;;  %s719_s18 = sphi %s756_s18, %s940_s18   ;;  %s715_s17 = sphi %s754_s17, %s939_s17   ;;  %s711_s16 = sphi %s752_s16, %s938_s16   ;;  %s707_s15 = sphi %s750_s15, %s937_s15  }
   0x4   : > { %s775_s21 = sadd.s32 1, %s719_s18   ;;  %s113_s22 = sadd.s32 1, %s715_s17 }
   0x5   : > { %s110_s23 = ssub.s32 %s719_s18, %s775_s21  ;;  %p123_p0 = scmp.ne.s32.totalorder %s715_s17, %s711_s16 }
   0x6   : > { %p111_p1 = scmp.eq.s32.totalorder %s110_s23, 0  ;;  %p124_p2 = scmp.eq.s32.totalorder %s771_s19, 3 }
   0x7   : > { %p129_p3 = scmp.ne.s32.totalorder %s711_s16, %s707_s15  ;;  %p130_p4 = scmp.eq.s32.totalorder %s488_s20, 3 }
   0x8   : > { %s786_s24 = scalar_select %p111_p1, %s715_s17, %s113_s22  }
   0x9   : > { %p788_p5 = por %p124_p2, %p123_p0  ;;  %p792_p6 = por %p130_p4, %p129_p3 }
   0xa   : > { %p491_p7 = scmp.ge.s32.totalorder %s719_s18, 1  ;;  %p165_p8 = scmp.lt.s32.totalorder %s719_s18, 5 }
   0xc   : > { %p166_p9 = pnand %p491_p7, %p165_p8 }
   0xd   : > { %p191_p10 = scmp.lt.s32.totalorder (!%p166_p9), %s771_s19, 3  ;;  %v721_v0 = vmov (!%p166_p9), 0.0|0.0   ;;  %vm722_vm0 = vmmov (!%p166_p9), 0   ;;  %v723_v1 = vmov (!%p166_p9), 0.0   ;;  %vm273_vm1 = vcmask (!%p166_p9), 261120   ;;  %v276_v2 = vld [vmem:[%s930_s2] sm:$0xff] (!%p166_p9) }
   0xe   : > { %169 = sbr.rel (%p166_p9) target bundleno = 479 (0x1df), region = 36  ;;  %580 = vmatprep.subr.bf16.mxu0 (!%p166_p9), %v721_v0  ;;  %542 = vmatprep.mubr.msk.f32.mxu0 (!%p166_p9), %vm722_vm0, %v723_v1  ;;  %v277_v3 = vld [vmem:[%s930_s2 + $0x8] sm:$0xff] (!%p166_p9)  ;;  %vm808_vm2 = vmpackc.low (!%p166_p9), %vm273_vm1, %vm273_vm1  ;;  %v278_v6 = vld [vmem:[%s930_s2 + $0x10] sm:$0xff] (!%p166_p9)  ;;  %vm199_vm3 = vcmask (!%p166_p9), 130048   ;;  %s514_s10 = sshll.u32 (!%p166_p9), %s771_s19, 7 }
   0xf   : > { %583 = vmatprep.subr.bf16.mxu1 (!%p166_p9), %v721_v0  ;;  %v584_v4 = vpack.c.bf16 (!%p166_p9), %v277_v3, %v276_v2  ;;  %577 = vmatprep.mubr.msk.f32.mxu1 (!%p166_p9), %vm722_vm0, %v723_v1  ;;  %v279_v7 = vld [vmem:[%s930_s2 + $0x18] sm:$0xff] (!%p166_p9)  ;;  %v196_v12 = vld [vmem:[%s929_s1] sm:$0xff] (!%p166_p9)  ;;  %v281_v14 = vld [vmem:[%s930_s2 + $0x28] sm:$0xff] (!%p166_p9)  ;;  %s886_s20 = scalar_lea.hbm (!%p166_p9), %s932_s4, %s514_s10 }
  0x10   : > { %v588_v11 = vpack.c.bf16 (!%p166_p9), %v279_v7, %v278_v6  ;;  %v280_v13 = vld [vmem:[%s930_s2 + $0x20] sm:$0xff] (!%p166_p9)  ;;  %v282_v16 = vld [vmem:[%s930_s2 + $0x30] sm:$0xff] (!%p166_p9)  ;;  %v283_v17 = vld [vmem:[%s930_s2 + $0x38] sm:$0xff] (!%p166_p9) }
  0x11   : > { %586 = vmatpush3.bf16.xpose.msk.msra.mxu1 (!%p166_p9), %vm808_vm2, %v584_v4  ;;  %v592_v15 = vpack.c.bf16 (!%p166_p9), %v281_v14, %v280_v13  ;;  %v596_v18 = vpack.c.bf16 (!%p166_p9), %v283_v17, %v282_v16  ;;  %v284_v19 = vld [vmem:[%s930_s2 + $0x40] sm:$0xff] (!%p166_p9)  ;;  %v285_v20 = vld [vmem:[%s930_s2 + $0x48] sm:$0xff] (!%p166_p9)  ;;  %v286_v22 = vld [vmem:[%s930_s2 + $0x50] sm:$0xff] (!%p166_p9) }
  0x12   : > { %587 = vmatprep.subr.bf16.mxu1 (!%p166_p9), %v721_v0  ;;  %v600_v21 = vpack.c.bf16 (!%p166_p9), %v285_v20, %v284_v19  ;;  %v287_v23 = vld [vmem:[%s930_s2 + $0x58] sm:$0xff] (!%p166_p9)  ;;  %v288_v25 = vld [vmem:[%s930_s2 + $0x60] sm:$0xff] (!%p166_p9)  ;;  %v289_v26 = vld [vmem:[%s930_s2 + $0x68] sm:$0xff] (!%p166_p9) }
  0x13   : > { %v604_v24 = vpack.c.bf16 (!%p166_p9), %v287_v23, %v286_v22  ;;  %v608_v27 = vpack.c.bf16 (!%p166_p9), %v289_v26, %v288_v25  ;;  %v290_v28 = vld [vmem:[%s930_s2 + $0x70] sm:$0xff] (!%p166_p9)  ;;  %v291_v29 = vld [vmem:[%s930_s2 + $0x78] sm:$0xff] (!%p166_p9)  ;;  %v292_v34 = vld [vmem:[%s931_s3] sm:$0xff] (!%p166_p9) }
  0x14   : > { %v612_v30 = vpack.c.bf16 (!%p166_p9), %v291_v29, %v290_v28 }
  0x15   : > { %s192_s5 = scalar_select %p191_p10, %s771_s19, 3 }
  0x16   : > { %s724_s19 = smov [#allocation3]  }
  0x17   : > { %s517_s6 = sshll.u32 %s192_s5, 4  ;;  %s661_s27 = sshll.u32 %s724_s19, 4  ;;  %s662_s27 = int_to_ptr.vmem [resolvable:$false] %s661_s27 }
  0x18   : > { %s195_s9 = scalar_lea.vmem %s928_s0, %s517_s6  ;;  %s188_s6 = sand.u32 1, %s711_s16  }
  0x19   : > { %v197_v8 = vld [vmem:[%s195_s9] sm:$0xff]  ;;  %v198_v9 = vld [vmem:[%s195_s9 + $0x8] sm:$0xff]  ;;  %590 = vmatpush3.bf16.xpose.msk.msra.mxu1 %vm808_vm2, %v588_v11  ;;  %s492_s7 = sshll.u32 %s188_s6, 3  ;;  %s416_s22 = scalar_lea.sflag [#allocation4], %s188_s6 }
  0x1a   : > { %v581_v10 = vpack.c.bf16 %v198_v9, %v197_v8  ;;  %591 = vmatprep.subr.bf16.mxu1 %v721_v0  ;;  %s190_s11 = scalar_lea.vmem [#allocation3], %s492_s7  ;;  %s663_s28 = scalar_lea.vmem %s662_s27, 256 }
  0x1b   : > { %s429_s12 = sshll.u32 %s190_s11, 4  ;;  %s888_s12 = int_to_ptr.vmem [resolvable:$true] %s429_s12 }
  0x1c   : > { %582 = vmatpush3.bf16.msra.mxu0 %v581_v10  ;;  %s657_s23 = scalar_lea.vmem %s888_s12, 128  ;;  %p664_p0 = scmp.lt.s32.totalorder %s888_s12, %s662_s27 }
  0x1d   : > { %p658_p11 = scmp.ne.s32.totalorder %s888_s12, %s657_s23  ;;  %p665_p1 = scmp.lt.s32.totalorder %s663_s28, %s657_s23 }
  0x1f   : > { %543 = vmatmul.mubr.msk.f32.vlgmr.msra.gmra.mrb[0].mxu0 %vm199_vm3, %v196_v12  ;;  %p659_p12 = pnand %p658_p11, %p788_p5  ;;  %p666_p2 = por %p665_p1, %p664_p0 }
  0x21   : > { %594 = vmatpush3.bf16.xpose.msk.msra.mxu1 %vm808_vm2, %v592_v15  ;;  %p660_p13 = pneg %p659_p12 }
  0x22   : > { %595 = vmatprep.subr.bf16.mxu1 %v721_v0 }
  0x23   : > { %p667_p3 = pnand %p666_p2, %p660_p13 }
  0x29   : > { %598 = vmatpush3.bf16.xpose.msk.msra.mxu1 %vm808_vm2, %v596_v18 }
  0x2a   : > { %599 = vmatprep.subr.bf16.mxu1 %v721_v0 }
  0x31   : > { %602 = vmatpush3.bf16.xpose.msk.msra.mxu1 %vm808_vm2, %v600_v21 }
  0x32   : > { %603 = vmatprep.subr.bf16.mxu1 %v721_v0 }
  0x39   : > { %606 = vmatpush3.bf16.xpose.msk.msra.mxu1 %vm808_vm2, %v604_v24 }
  0x3a   : > { %607 = vmatprep.subr.bf16.mxu1 %v721_v0 }
  0x41   : > { %610 = vmatpush3.bf16.xpose.msk.msra.mxu1 %vm808_vm2, %v608_v27 }
  0x42   : > { %611 = vmatprep.subr.bf16.mxu1 %v721_v0 }
  0x49   : > { %614 = vmatpush3.bf16.xpose.msk.msra.mxu1 %vm808_vm2, %v612_v30 }
  0xf2   : > { %v269_v31 = vpop.f32.mrb[0].mxu0 }
  0xf3   : > { %274 = vst.msk [vmem:[#allocation2] sm:$0xff] %vm273_vm1, %v269_v31  ;;  %v544_v32 = vpop.f32.mrb[1].mxu0 }
  0xfa   : > { %v275_v33 = vld [vmem:[#allocation2] sm:$0xff] }
  0xfb   : > { %578 = vmatmul.mubr.msk.f32.vlgmr.msra.gmra.mrb[0].mxu1 %vm273_vm1, %v275_v33 }
 0x1ce   : > { %v410_v35 = vpop.f32.mrb[0].mxu1 }
 0x1cf   : > { %v411_v36 = vadd.f32 %v410_v35, %v292_v34  ;;  %v579_v37 = vpop.f32.mrb[1].mxu1 }
 0x1d1   : > { %414 = vst [vmem:[%s190_s11] sm:$0xff] %v411_v36 }
 0x1d2   : > { %670 = shalt.err (!%p667_p3)
}
 0x1d3   : > { %s671_s29 = scalar_lea.hbm %s886_s20, 128  ;;  %s675_s6 = scalar_lea.hbm %s932_s4, 512 }
 0x1d4   : > { %p672_p4 = scmp.ne.s32.totalorder %s886_s20, %s671_s29  ;;  %p676_p9 = scmp.lt.u32.totalorder %s886_s20, %s932_s4 }
 0x1d5   : > { %p677_p10 = scmp.lt.u32.totalorder %s675_s6, %s671_s29  ;;  %p679_p12 = scmp.lt.u32.totalorder %s671_s29, %s886_s20 }
 0x1d6   : > { %p673_p7 = pnand %p672_p4, %p788_p5 }
 0x1d7   : > { %p678_p11 = por %p677_p10, %p676_p9 }
 0x1d8   : > { %p674_p8 = pneg %p673_p7 }
 0x1d9   : > { %p680_p13 = por %p679_p12, %p678_p11 }
 0x1db   : > { %p681_p0 = pnand %p680_p13, %p674_p8 }
 0x1dd   : > { %684 = shalt.err (!%p681_p0)
}
 0x1de   : > { %615 = dma.vmem_to_hbm [thread:$0]  (%p788_p5), %s888_s12, 128, %s886_s20, %s416_s22  }
 0x1df PF: > { %p621_p1 = scmp.ge.s32.totalorder %s719_s18, 2  ;;  %s441_s9 = sand.u32 1, %s707_s15  }
 0x1e0   : > { %s442_s10 = scalar_lea.sflag [#allocation4], %s441_s9 }
 0x1e1   : > { %p618_p2 = pnand %p621_p1, %p792_p6 }
 0x1e3   : > { %702 = dma.done.wait (!%p618_p2), %s442_s10, 128  }
 0x1e4   : > { %704 = vsyncadd (!%p618_p2), %s442_s10, 4294967168  ;;  %p14_p3 = scmp.ge.s32.totalorder %s775_s21, 6   ;;  %s937_s15 = smov %s711_s16 }
 0x1e5   : > { %s938_s16 = smov %s715_s17  ;;  %s939_s17 = smov %s786_s24 }
 0x1e6   : > { %s940_s18 = smov %s775_s21  ;;  %16 = sbr.rel (!%p14_p3) target bundleno = 3 (0x3), region = 71 }
 0x1ed   :  { %447 = vsyncpa [#allocation4], 1 }
 0x1ee   :  { %449 = vsyncpa [#allocation4 + $0x1], 1 }

// kernel: tpu_custom_call.1
= control target key start
LH: loop header
LB: loop body
LE: loop exit
PB: predicated region body
PF: predicated region fallthrough
CT: control target
= control target key end

     0   :  { %9 = vsyncpa [#allocation4], 0  ;;  %s928_s0 = inlined_call_operand.vmem [shape: f32[4,16,32], index: 0, kind: input, shape index: {}]   ;;  %s929_s1 = inlined_call_operand.vmem [shape: f32[8,16], index: 1, kind: input, shape index: {}]   ;;  %s930_s2 = inlined_call_operand.vmem [shape: f32[128,32], index: 2, kind: input, shape index: {}]   ;;  %s931_s3 = inlined_call_operand.vmem [shape: f32[8,128], index: 3, kind: input, shape index: {}]   ;;  %s932_s4 = inlined_call_operand.hbm [shape: f32[32,128], index: 4, kind: output, shape index: {}]  }
   0x1   :  { %11 = vsyncpa [#allocation4 + $0x1], 0  ;;  %s750_s15 = smov 0   ;;  %s752_s16 = smov 0  }
   0x2   :  { %s754_s17 = smov 0   ;;  %s756_s18 = smov 0  }
   0x3 LB: > { %s771_s19 = sadd.s32 4294967295, %s719_s18   ;;  %s488_s20 = sadd.s32 4294967294, %s719_s18   ;;  %s719_s18 = sphi %s756_s18, %s940_s18   ;;  %s715_s17 = sphi %s754_s17, %s939_s17   ;;  %s711_s16 = sphi %s752_s16, %s938_s16   ;;  %s707_s15 = sphi %s750_s15, %s937_s15  }
   0x4   : > { %s775_s21 = sadd.s32 1, %s719_s18   ;;  %s113_s22 = sadd.s32 1, %s715_s17 }
   0x5   : > { %s110_s23 = ssub.s32 %s719_s18, %s775_s21  ;;  %p123_p0 = scmp.ne.s32.totalorder %s715_s17, %s711_s16 }
   0x6   : > { %p111_p1 = scmp.eq.s32.totalorder %s110_s23, 0  ;;  %p124_p2 = scmp.eq.s32.totalorder %s771_s19, 3 }
   0x7   : > { %p129_p3 = scmp.ne.s32.totalorder %s711_s16, %s707_s15  ;;  %p130_p4 = scmp.eq.s32.totalorder %s488_s20, 3 }
   0x8   : > { %s786_s24 = scalar_select %p111_p1, %s715_s17, %s113_s22  }
   0x9   : > { %p788_p5 = por %p124_p2, %p123_p0  ;;  %p792_p6 = por %p130_p4, %p129_p3 }
   0xa   : > { %p491_p7 = scmp.ge.s32.totalorder %s719_s18, 1  ;;  %p165_p8 = scmp.lt.s32.totalorder %s719_s18, 5 }
   0xc   : > { %p166_p9 = pnand %p491_p7, %p165_p8 }
   0xd   : > { %p191_p10 = scmp.lt.s32.totalorder (!%p166_p9), %s771_s19, 3  ;;  %v721_v0 = vmov (!%p166_p9), 0.0|0.0   ;;  %vm722_vm0 = vmmov (!%p166_p9), 0   ;;  %v723_v1 = vmov (!%p166_p9), 0.0   ;;  %vm273_vm1 = vcmask (!%p166_p9), 261120   ;;  %v276_v2 = vld [vmem:[%s930_s2] sm:$0xff] (!%p166_p9) }
   0xe   : > { %169 = sbr.rel (%p166_p9) target bundleno = 479 (0x1df), region = 36  ;;  %580 = vmatprep.subr.bf16.mxu0 (!%p166_p9), %v721_v0  ;;  %542 = vmatprep.mubr.msk.f32.mxu0 (!%p166_p9), %vm722_vm0, %v723_v1  ;;  %v277_v3 = vld [vmem:[%s930_s2 + $0x8] sm:$0xff] (!%p166_p9)  ;;  %vm808_vm2 = vmpackc.low (!%p166_p9), %vm273_vm1, %vm273_vm1  ;;  %v278_v6 = vld [vmem:[%s930_s2 + $0x10] sm:$0xff] (!%p166_p9)  ;;  %vm199_vm3 = vcmask (!%p166_p9), 130048   ;;  %s514_s10 = sshll.u32 (!%p166_p9), %s771_s19, 7 }
   0xf   : > { %583 = vmatprep.subr.bf16.mxu1 (!%p166_p9), %v721_v0  ;;  %v584_v4 = vpack.c.bf16 (!%p166_p9), %v277_v3, %v276_v2  ;;  %577 = vmatprep.mubr.msk.f32.mxu1 (!%p166_p9), %vm722_vm0, %v723_v1  ;;  %v279_v7 = vld [vmem:[%s930_s2 + $0x18] sm:$0xff] (!%p166_p9)  ;;  %v196_v12 = vld [vmem:[%s929_s1] sm:$0xff] (!%p166_p9)  ;;  %v281_v14 = vld [vmem:[%s930_s2 + $0x28] sm:$0xff] (!%p166_p9)  ;;  %s886_s20 = scalar_lea.hbm (!%p166_p9), %s932_s4, %s514_s10 }
  0x10   : > { %v588_v11 = vpack.c.bf16 (!%p166_p9), %v279_v7, %v278_v6  ;;  %v280_v13 = vld [vmem:[%s930_s2 + $0x20] sm:$0xff] (!%p166_p9)  ;;  %v282_v16 = vld [vmem:[%s930_s2 + $0x30] sm:$0xff] (!%p166_p9)  ;;  %v283_v17 = vld [vmem:[%s930_s2 + $0x38] sm:$0xff] (!%p166_p9) }
  0x11   : > { %586 = vmatpush3.bf16.xpose.msk.msra.mxu1 (!%p166_p9), %vm808_vm2, %v584_v4  ;;  %v592_v15 = vpack.c.bf16 (!%p166_p9), %v281_v14, %v280_v13  ;;  %v596_v18 = vpack.c.bf16 (!%p166_p9), %v283_v17, %v282_v16  ;;  %v284_v19 = vld [vmem:[%s930_s2 + $0x40] sm:$0xff] (!%p166_p9)  ;;  %v285_v20 = vld [vmem:[%s930_s2 + $0x48] sm:$0xff] (!%p166_p9)  ;;  %v286_v22 = vld [vmem:[%s930_s2 + $0x50] sm:$0xff] (!%p166_p9) }
  0x12   : > { %587 = vmatprep.subr.bf16.mxu1 (!%p166_p9), %v721_v0  ;;  %v600_v21 = vpack.c.bf16 (!%p166_p9), %v285_v20, %v284_v19  ;;  %v287_v23 = vld [vmem:[%s930_s2 + $0x58] sm:$0xff] (!%p166_p9)  ;;  %v288_v25 = vld [vmem:[%s930_s2 + $0x60] sm:$0xff] (!%p166_p9)  ;;  %v289_v26 = vld [vmem:[%s930_s2 + $0x68] sm:$0xff] (!%p166_p9) }
  0x13   : > { %v604_v24 = vpack.c.bf16 (!%p166_p9), %v287_v23, %v286_v22  ;;  %v608_v27 = vpack.c.bf16 (!%p166_p9), %v289_v26, %v288_v25  ;;  %v290_v28 = vld [vmem:[%s930_s2 + $0x70] sm:$0xff] (!%p166_p9)  ;;  %v291_v29 = vld [vmem:[%s930_s2 + $0x78] sm:$0xff] (!%p166_p9)  ;;  %v292_v34 = vld [vmem:[%s931_s3] sm:$0xff] (!%p166_p9) }
  0x14   : > { %v612_v30 = vpack.c.bf16 (!%p166_p9), %v291_v29, %v290_v28 }
  0x15   : > { %s192_s5 = scalar_select %p191_p10, %s771_s19, 3 }
  0x16   : > { %s724_s19 = smov [#allocation3]  }
  0x17   : > { %s517_s6 = sshll.u32 %s192_s5, 4  ;;  %s661_s27 = sshll.u32 %s724_s19, 4  ;;  %s662_s27 = int_to_ptr.vmem [resolvable:$false] %s661_s27 }
  0x18   : > { %s195_s9 = scalar_lea.vmem %s928_s0, %s517_s6  ;;  %s188_s6 = sand.u32 1, %s711_s16  }
  0x19   : > { %v197_v8 = vld [vmem:[%s195_s9] sm:$0xff]  ;;  %v198_v9 = vld [vmem:[%s195_s9 + $0x8] sm:$0xff]  ;;  %590 = vmatpush3.bf16.xpose.msk.msra.mxu1 %vm808_vm2, %v588_v11  ;;  %s492_s7 = sshll.u32 %s188_s6, 3  ;;  %s416_s22 = scalar_lea.sflag [#allocation4], %s188_s6 }
  0x1a   : > { %v581_v10 = vpack.c.bf16 %v198_v9, %v197_v8  ;;  %591 = vmatprep.subr.bf16.mxu1 %v721_v0  ;;  %s190_s11 = scalar_lea.vmem [#allocation3], %s492_s7  ;;  %s663_s28 = scalar_lea.vmem %s662_s27, 256 }
  0x1b   : > { %s429_s12 = sshll.u32 %s190_s11, 4  ;;  %s888_s12 = int_to_ptr.vmem [resolvable:$true] %s429_s12 }
  0x1c   : > { %582 = vmatpush3.bf16.msra.mxu0 %v581_v10  ;;  %s657_s23 = scalar_lea.vmem %s888_s12, 128  ;;  %p664_p0 = scmp.lt.s32.totalorder %s888_s12, %s662_s27 }
  0x1d   : > { %p658_p11 = scmp.ne.s32.totalorder %s888_s12, %s657_s23  ;;  %p665_p1 = scmp.lt.s32.totalorder %s663_s28, %s657_s23 }
  0x1f   : > { %543 = vmatmul.mubr.msk.f32.vlgmr.msra.gmra.mrb[0].mxu0 %vm199_vm3, %v196_v12  ;;  %p659_p12 = pnand %p658_p11, %p788_p5  ;;  %p666_p2 = por %p665_p1, %p664_p0 }
  0x21   : > { %594 = vmatpush3.bf16.xpose.msk.msra.mxu1 %vm808_vm2, %v592_v15  ;;  %p660_p13 = pneg %p659_p12 }
  0x22   : > { %595 = vmatprep.subr.bf16.mxu1 %v721_v0 }
  0x23   : > { %p667_p3 = pnand %p666_p2, %p660_p13 }
  0x29   : > { %598 = vmatpush3.bf16.xpose.msk.msra.mxu1 %vm808_vm2, %v596_v18 }
  0x2a   : > { %599 = vmatprep.subr.bf16.mxu1 %v721_v0 }
  0x31   : > { %602 = vmatpush3.bf16.xpose.msk.msra.mxu1 %vm808_vm2, %v600_v21 }
  0x32   : > { %603 = vmatprep.subr.bf16.mxu1 %v721_v0 }
  0x39   : > { %606 = vmatpush3.bf16.xpose.msk.msra.mxu1 %vm808_vm2, %v604_v24 }
  0x3a   : > { %607 = vmatprep.subr.bf16.mxu1 %v721_v0 }
  0x41   : > { %610 = vmatpush3.bf16.xpose.msk.msra.mxu1 %vm808_vm2, %v608_v27 }
  0x42   : > { %611 = vmatprep.subr.bf16.mxu1 %v721_v0 }
  0x49   : > { %614 = vmatpush3.bf16.xpose.msk.msra.mxu1 %vm808_vm2, %v612_v30 }
  0xf2   : > { %v269_v31 = vpop.f32.mrb[0].mxu0 }
  0xf3   : > { %274 = vst.msk [vmem:[#allocation2] sm:$0xff] %vm273_vm1, %v269_v31  ;;  %v544_v32 = vpop.f32.mrb[1].mxu0 }
  0xfa   : > { %v275_v33 = vld [vmem:[#allocation2] sm:$0xff] }
  0xfb   : > { %578 = vmatmul.mubr.msk.f32.vlgmr.msra.gmra.mrb[0].mxu1 %vm273_vm1, %v275_v33 }
 0x1ce   : > { %v410_v35 = vpop.f32.mrb[0].mxu1 }
 0x1cf   : > { %v411_v36 = vadd.f32 %v410_v35, %v292_v34  ;;  %v579_v37 = vpop.f32.mrb[1].mxu1 }
 0x1d1   : > { %414 = vst [vmem:[%s190_s11] sm:$0xff] %v411_v36 }
 0x1d2   : > { %670 = shalt.err (!%p667_p3)
}
 0x1d3   : > { %s671_s29 = scalar_lea.hbm %s886_s20, 128  ;;  %s675_s6 = scalar_lea.hbm %s932_s4, 512 }
 0x1d4   : > { %p672_p4 = scmp.ne.s32.totalorder %s886_s20, %s671_s29  ;;  %p676_p9 = scmp.lt.u32.totalorder %s886_s20, %s932_s4 }
 0x1d5   : > { %p677_p10 = scmp.lt.u32.totalorder %s675_s6, %s671_s29  ;;  %p679_p12 = scmp.lt.u32.totalorder %s671_s29, %s886_s20 }
 0x1d6   : > { %p673_p7 = pnand %p672_p4, %p788_p5 }
 0x1d7   : > { %p678_p11 = por %p677_p10, %p676_p9 }
 0x1d8   : > { %p674_p8 = pneg %p673_p7 }
 0x1d9   : > { %p680_p13 = por %p679_p12, %p678_p11 }
 0x1db   : > { %p681_p0 = pnand %p680_p13, %p674_p8 }
 0x1dd   : > { %684 = shalt.err (!%p681_p0)
}
 0x1de   : > { %615 = dma.vmem_to_hbm [thread:$0]  (%p788_p5), %s888_s12, 128, %s886_s20, %s416_s22  }
 0x1df PF: > { %p621_p1 = scmp.ge.s32.totalorder %s719_s18, 2  ;;  %s441_s9 = sand.u32 1, %s707_s15  }
 0x1e0   : > { %s442_s10 = scalar_lea.sflag [#allocation4], %s441_s9 }
 0x1e1   : > { %p618_p2 = pnand %p621_p1, %p792_p6 }
 0x1e3   : > { %702 = dma.done.wait (!%p618_p2), %s442_s10, 128  }
 0x1e4   : > { %704 = vsyncadd (!%p618_p2), %s442_s10, 4294967168  ;;  %p14_p3 = scmp.ge.s32.totalorder %s775_s21, 6   ;;  %s937_s15 = smov %s711_s16 }
 0x1e5   : > { %s938_s16 = smov %s715_s17  ;;  %s939_s17 = smov %s786_s24 }
 0x1e6   : > { %s940_s18 = smov %s775_s21  ;;  %16 = sbr.rel (!%p14_p3) target bundleno = 3 (0x3), region = 71 }
 0x1ed   :  { %447 = vsyncpa [#allocation4], 1 }
 0x1ee   :  { %449 = vsyncpa [#allocation4 + $0x1], 1 }

</bundles_post_ra>
